<compile_context>
chip_gen: v7x
topology: tpu7x:2x2x1
jax: 0.10.0
libtpu: 0.0.40
codegen_flags: <defaults>
</compile_context>

<pallas_src>
import functools

import jax
import jax.numpy as jnp
from jax.experimental import pallas as pl
from jax.experimental.pallas import tpu as pltpu


def _qconv_gemm_kernel(x_ref, w_ref, zpcs_ref, b_ref, o_ref, *,
                       mul_scale, inv_out_scale, out_zp):
    """x_ref: [bm, K] uint8, w_ref: [K, Cp] bf16 (w_zp already removed),
    zpcs_ref: [1, Cp] f32 (= x_zp * colsum(w_eff), exact integers),
    b_ref: [1, Cp] f32, o_ref: [bm, Cp] uint8."""
    # uint8 -> f32 -> bf16: exact for codes 0..255; MXU consumes bf16 natively.
    x = x_ref[...].astype(jnp.float32).astype(jnp.bfloat16)
    acc = jnp.dot(x, w_ref[...], preferred_element_type=jnp.float32)
    acc = acc - zpcs_ref[...]                 # fold input zero-point analytically
    y = acc * mul_scale + b_ref[...]          # float conv output
    q = jnp.round(y * inv_out_scale) + out_zp # requantize
    q = jnp.clip(q, 0.0, 255.0)
    o_ref[...] = q.astype(jnp.int32).astype(jnp.uint8)


def quantized_conv2d(x_q, x_scale, x_zp, w_q, w_scale, w_zp, bias,
                     stride, padding, dilation, out_scale, out_zp,
                     block_m=512):
    """groups == 1 only. x_q: uint8 NCHW, w_q: int8 [C_out, C_in, KH, KW]."""
    N, C_in, H, W = x_q.shape
    C_out, C_in_w, KH, KW = w_q.shape
    assert C_in_w == C_in, "only groups=1 implemented"
    sh, sw = stride
    ph, pw = padding
    dh, dw = dilation
    OH = (H + 2 * ph - dh * (KH - 1) - 1) // sh + 1
    OW = (W + 2 * pw - dw * (KW - 1) - 1) // sw + 1

    # --- glue: im2col, kept in uint8 (padding in the quantized domain == x_zp) ---
    xp = jnp.pad(x_q, ((0, 0), (0, 0), (ph, ph), (pw, pw)),
                 constant_values=jnp.uint8(x_zp))
    slabs = []
    for kh in range(KH):
        for kw in range(KW):
            h0, w0 = kh * dh, kw * dw
            slabs.append(xp[:, :,
                            h0:h0 + (OH - 1) * sh + 1:sh,
                            w0:w0 + (OW - 1) * sw + 1:sw])   # [N, C_in, OH, OW] u8
    patches = jnp.stack(slabs, axis=-1)                      # [N, C_in, OH, OW, KH*KW]
    patches = patches.transpose(0, 2, 3, 1, 4)               # [N, OH, OW, C_in, KH*KW]
    M = N * OH * OW
    K = C_in * KH * KW
    patches = patches.reshape(M, K)                          # [M, K] uint8

    # pad M so it tiles evenly; padded rows use x_zp (sliced off afterwards)
    Mp = pl.cdiv(M, block_m) * block_m
    if Mp != M:
        patches = jnp.pad(patches, ((0, Mp - M), (0, 0)),
                          constant_values=jnp.uint8(x_zp))

    # --- hoisted weight-side prep (done once, on host / XLA) ---
    Cp = pl.cdiv(C_out, 128) * 128                           # lane-dense output width
    w_eff = w_q.reshape(C_out, K).T.astype(jnp.float32) - float(w_zp)   # [K, C_out]
    zp_colsum = float(x_zp) * jnp.sum(w_eff, axis=0, keepdims=True)     # [1, C_out]
    w_eff_bf = w_eff.astype(jnp.bfloat16)                    # exact (|w_eff| <= 255)
    w_pad = jnp.pad(w_eff_bf, ((0, 0), (0, Cp - C_out)))                # [K, Cp] bf16
    zpcs_pad = jnp.pad(zp_colsum.astype(jnp.float32), ((0, 0), (0, Cp - C_out)))
    bias_pad = jnp.pad(bias.reshape(1, C_out).astype(jnp.float32),
                       ((0, 0), (0, Cp - C_out)))                       # [1, Cp] f32

    kernel = functools.partial(
        _qconv_gemm_kernel,
        mul_scale=float(x_scale * w_scale),
        inv_out_scale=float(1.0 / out_scale),
        out_zp=float(out_zp))

    grid_m = Mp // block_m
    bytes_accessed = (Mp * K                # uint8 patches
                      + K * Cp * 2          # bf16 weights
                      + 2 * Cp * 4          # bias + zp*colsum rows
                      + Mp * Cp)            # uint8 output
    out = pl.pallas_call(
        kernel,
        out_shape=jax.ShapeDtypeStruct((Mp, Cp), jnp.uint8),
        grid=(grid_m,),
        in_specs=[
            pl.BlockSpec((block_m, K), lambda i: (i, 0)),    # uint8 patches tile
            pl.BlockSpec((K, Cp), lambda i: (0, 0)),         # resident bf16 weights
            pl.BlockSpec((1, Cp), lambda i: (0, 0)),         # x_zp * colsum(w_eff)
            pl.BlockSpec((1, Cp), lambda i: (0, 0)),         # bias row
        ],
        out_specs=pl.BlockSpec((block_m, Cp), lambda i: (i, 0)),
        compiler_params=pltpu.CompilerParams(
            dimension_semantics=("parallel",)),
        cost_estimate=pl.CostEstimate(
            flops=2 * Mp * K * Cp,
            transcendentals=0,
            bytes_accessed=bytes_accessed),
    )(patches, w_pad, zpcs_pad, bias_pad)

    # glue: drop M/C_out padding (already uint8) and restore NCHW layout.
    out = out[:M, :C_out].reshape(N, OH, OW, C_out)
    return out.transpose(0, 3, 1, 2)                         # [N, C_out, OH, OW]


def _reference(x_q, x_scale, x_zp, w_q, w_scale, w_zp, bias,
               stride, padding, dilation, out_scale, out_zp):
    """Pure-JAX reference of the same quantized-conv math (for validation)."""
    N, C_in, H, W = x_q.shape
    C_out, _, KH, KW = w_q.shape
    sh, sw = stride
    ph, pw = padding
    dh, dw = dilation
    OH = (H + 2 * ph - dh * (KH - 1) - 1) // sh + 1
    OW = (W + 2 * pw - dw * (KW - 1) - 1) // sw + 1
    xp = jnp.pad(x_q.astype(jnp.int32), ((0, 0), (0, 0), (ph, ph), (pw, pw)),
                 constant_values=x_zp) - x_zp
    wq = w_q.astype(jnp.int32) - w_zp
    acc = jnp.zeros((N, C_out, OH, OW), jnp.int32)
    for kh in range(KH):
        for kw in range(KW):
            h0, w0 = kh * dh, kw * dw
            xs = xp[:, :, h0:h0 + (OH - 1) * sh + 1:sh,
                    w0:w0 + (OW - 1) * sw + 1:sw]
            acc = acc + jnp.einsum('nchw,oc->nohw', xs, wq[:, :, kh, kw])
    y = acc.astype(jnp.float32) * (x_scale * w_scale) + bias.reshape(1, -1, 1, 1)
    q = jnp.clip(jnp.round(y / out_scale) + out_zp, 0.0, 255.0)
    return q.astype(jnp.uint8)


if __name__ == "__main__":
    # Module config: Conv2d(in_channels=4, out_channels=8, kernel_size=3,
    #                       stride=1, padding=1, dilation=1, groups=1, bias=True)
    N, C_in, H, W = 2, 4, 16, 16
    C_out, KH, KW = 8, 3, 3
    stride, padding, dilation = (1, 1), (1, 1), (1, 1)

    key = jax.random.PRNGKey(0)
    kx, kw, kb = jax.random.split(key, 3)

    # Deterministic synthetic quantized parameters (stand-in for checkpoint /
    # observer-calibrated values; module __init__ gives scale=1, zp=0 defaults).
    x_q = jax.random.randint(kx, (N, C_in, H, W), 0, 256, dtype=jnp.int32).astype(jnp.uint8)
    w_q = jax.random.randint(kw, (C_out, C_in, KH, KW), -128, 128, dtype=jnp.int32).astype(jnp.int8)
    bias = jax.random.normal(kb, (C_out,), jnp.float32)

    x_scale, x_zp = 0.05, 128     # input  quant params (quint8)
    w_scale, w_zp = 0.02, 0       # weight quant params (qint8, per-tensor)
    out_scale, out_zp = 0.25, 64  # module's self.scale / self.zero_point

    out = quantized_conv2d(x_q, x_scale, x_zp, w_q, w_scale, w_zp, bias,
                           stride, padding, dilation, out_scale, out_zp)
    out = jax.block_until_ready(out)

    ref = _reference(x_q, x_scale, x_zp, w_q, w_scale, w_zp, bias,
                     stride, padding, dilation, out_scale, out_zp)
    assert out.shape == (N, C_out, H, W) and out.dtype == jnp.uint8
    assert jnp.array_equal(out, ref), "mismatch vs reference quantized conv"

    print("KERNEL_OK")
</pallas_src>

<mosaic_0001>
module attributes {stable_mosaic.version = 11 : i64} {
  func.func @_qconv_gemm_kernel(%arg0: i32, %arg1: memref<512x36xi8, #tpu.memory_space<vmem>>, %arg2: memref<36x128xbf16, #tpu.memory_space<vmem>>, %arg3: memref<1x128xf32, #tpu.memory_space<vmem>>, %arg4: memref<1x128xf32, #tpu.memory_space<vmem>>, %arg5: memref<512x128xi8, #tpu.memory_space<vmem>>) attributes {dimension_semantics = [#tpu.dimension_semantics<parallel>], iteration_bounds = array<i64: 1>, scalar_prefetch = 0 : i64, scratch_operands = 0 : i64, tpu.core_type = #tpu.core_type<tc>, window_params = [{transform_indices = @transform_0, window_bounds = array<i64: 512, 36>}, {pipeline_mode = #tpu.pipeline_mode<synchronous>, transform_indices = @transform_1, window_bounds = array<i64: 36, 128>}, {pipeline_mode = #tpu.pipeline_mode<synchronous>, transform_indices = @transform_2, window_bounds = array<i64: 1, 128>}, {pipeline_mode = #tpu.pipeline_mode<synchronous>, transform_indices = @transform_3, window_bounds = array<i64: 1, 128>}, {transform_indices = @transform_4, window_bounds = array<i64: 512, 128>}]} {
    %c0 = arith.constant 0 : index
    %c0_0 = arith.constant 0 : index
    %0 = vector.load %arg1[%c0, %c0_0] : memref<512x36xi8, #tpu.memory_space<vmem>>, vector<512x36xi8>
    %1 = arith.uitofp %0 : vector<512x36xi8> to vector<512x36xf32>
    %2 = arith.truncf %1 : vector<512x36xf32> to vector<512x36xbf16>
    %c0_1 = arith.constant 0 : index
    %c0_2 = arith.constant 0 : index
    %3 = vector.load %arg2[%c0_1, %c0_2] : memref<36x128xbf16, #tpu.memory_space<vmem>>, vector<36x128xbf16>
    %cst = arith.constant dense<0.000000e+00> : vector<512x128xf32>
    %4 = tpu.matmul %2, %3, %cst {dimension_numbers = #tpu.dot_dimension_numbers<[1], [0], [0], [1], [0, 0, 1, 1], [], []>} : vector<512x36xbf16>, vector<36x128xbf16>, vector<512x128xf32> -> vector<512x128xf32>
    %c0_3 = arith.constant 0 : index
    %c0_4 = arith.constant 0 : index
    %5 = vector.load %arg3[%c0_3, %c0_4] : memref<1x128xf32, #tpu.memory_space<vmem>>, vector<1x128xf32>
    %6 = vector.broadcast %5 : vector<1x128xf32> to vector<512x128xf32>
    %7 = arith.subf %4, %6 : vector<512x128xf32>
    %cst_5 = arith.constant 1.000000e-03 : f32
    %8 = vector.broadcast %cst_5 : f32 to vector<512x128xf32>
    %9 = arith.mulf %7, %8 : vector<512x128xf32>
    %c0_6 = arith.constant 0 : index
    %c0_7 = arith.constant 0 : index
    %10 = vector.load %arg4[%c0_6, %c0_7] : memref<1x128xf32, #tpu.memory_space<vmem>>, vector<1x128xf32>
    %11 = vector.broadcast %10 : vector<1x128xf32> to vector<512x128xf32>
    %12 = arith.addf %9, %11 : vector<512x128xf32>
    %cst_8 = arith.constant 4.000000e+00 : f32
    %13 = vector.broadcast %cst_8 : f32 to vector<512x128xf32>
    %14 = arith.mulf %12, %13 : vector<512x128xf32>
    %15 = math.roundeven %14 : vector<512x128xf32>
    %cst_9 = arith.constant 6.400000e+01 : f32
    %16 = vector.broadcast %cst_9 : f32 to vector<512x128xf32>
    %17 = arith.addf %15, %16 : vector<512x128xf32>
    %cst_10 = arith.constant 0.000000e+00 : f32
    %cst_11 = arith.constant 2.550000e+02 : f32
    %18 = vector.broadcast %cst_10 : f32 to vector<512x128xf32>
    %19 = arith.maximumf %18, %17 : vector<512x128xf32>
    %20 = vector.broadcast %cst_11 : f32 to vector<512x128xf32>
    %21 = arith.minimumf %20, %19 : vector<512x128xf32>
    %22 = arith.fptosi %21 : vector<512x128xf32> to vector<512x128xi32>
    %23 = arith.trunci %22 : vector<512x128xi32> to vector<512x128xi8>
    %c0_12 = arith.constant 0 : index
    %c0_13 = arith.constant 0 : index
    %24 = vector.load %arg5[%c0_12, %c0_13] : memref<512x128xi8, #tpu.memory_space<vmem>>, vector<512x128xi8>
    tpu.vector_store %arg5[%c0_12, %c0_13], %23 {strides = array<i32>} : memref<512x128xi8, #tpu.memory_space<vmem>>, vector<512x128xi8>,
    return
  }
  func.func @transform_0(%arg0: i32) -> (i32, i32) {
    %c0_i32 = arith.constant 0 : i32
    %c0_i32_0 = arith.constant 0 : i32
    return %arg0, %c0_i32 : i32, i32
  }
  func.func @transform_1(%arg0: i32) -> (i32, i32) {
    %c0_i32 = arith.constant 0 : i32
    %c0_i32_0 = arith.constant 0 : i32
    %c0_i32_1 = arith.constant 0 : i32
    return %c0_i32, %c0_i32_0 : i32, i32
  }
  func.func @transform_2(%arg0: i32) -> (i32, i32) {
    %c0_i32 = arith.constant 0 : i32
    %c0_i32_0 = arith.constant 0 : i32
    %c0_i32_1 = arith.constant 0 : i32
    return %c0_i32, %c0_i32_0 : i32, i32
  }
  func.func @transform_3(%arg0: i32) -> (i32, i32) {
    %c0_i32 = arith.constant 0 : i32
    %c0_i32_0 = arith.constant 0 : i32
    %c0_i32_1 = arith.constant 0 : i32
    return %c0_i32, %c0_i32_0 : i32, i32
  }
  func.func @transform_4(%arg0: i32) -> (i32, i32) {
    %c0_i32 = arith.constant 0 : i32
    %c0_i32_0 = arith.constant 0 : i32
    return %arg0, %c0_i32 : i32, i32
  }
}

</mosaic_0001>

<bundles_post_ra>
// kernel: tpu_custom_call.1
= control target key start
LH: loop header
LB: loop body
LE: loop exit
PB: predicated region body
PF: predicated region fallthrough
CT: control target
= control target key end

     0   :  { %vm87_vm0 = vcmask 293888   ;;  %vm184_vm1 = vcmask 1041408   ;;  %s2002_s0 = inlined_call_operand.vmem [shape: u8[512,36], index: 0, kind: input, shape index: {}]   ;;  %s2003_s1 = inlined_call_operand.vmem [shape: bf16[36,128], index: 1, kind: input, shape index: {}]   ;;  %s2004_s2 = inlined_call_operand.vmem [shape: f32[1,128], index: 2, kind: input, shape index: {}]   ;;  %s2005_s3 = inlined_call_operand.vmem [shape: f32[1,128], index: 3, kind: input, shape index: {}]   ;;  %s2006_s4 = inlined_call_operand.hbm [shape: u8[512,128], index: 4, kind: output, shape index: {}]  }
   0x1   :  { %v1492_v0 = vld [vmem:[%s2003_s1] sm:$0xff]   ;;  %v1493_v1 = vld [vmem:[%s2003_s1 + $0x8] sm:$0xff]   ;;  %v1494_v5 = vld [vmem:[%s2003_s1 + $0x10] ss:$0 sps:$4 sm:$0x33]  }
   0x2   :  { %1219 = vmatprep.subr.bf16.mxu0 %v1492_v0  ;;  %1289 = vmatprep.subr.bf16.mxu1 %v1492_v0  ;;  %v19_v2 = vld [vmem:[%s2002_s0] sm:$0xff]  ;;  %v186_v7 = vsel %vm184_vm1, %v1494_v5, 0  ;;  %v20_v8 = vld [vmem:[%s2002_s0 + $0x8] sm:$0xff] }
   0x3   :  { %1220 = vmatpush3.bf16.msra.mxu0 %v1492_v0  ;;  %1292 = vmatpush3.bf16.msra.mxu1 %v1492_v0  ;;  %v35_v3 = vunpack.c.l.u8.bf16 %v19_v2  ;;  %v27_v4 = vld [vmem:[%s2002_s0 + $0x40] sm:$0xff]  ;;  %v28_v9 = vld [vmem:[%s2002_s0 + $0x48] sm:$0xff] }
   0x4   :  { %1221 = vmatprep.subr.bf16.mxu0 %v1493_v1  ;;  %1290 = vmatprep.subr.bf16.mxu1 %v1493_v1  ;;  %v51_v6 = vunpack.c.l.u8.bf16 %v27_v4 }
   0x5   :  { %1225 = vmatprep.mubr.msk.bf16.mxu0 %vm87_vm0, %v35_v3 }
   0x6   :  { %1257 = vmatprep.mubr.msk.bf16.mxu1 %vm87_vm0, %v51_v6 }
   0x7   :  { %1222 = vmatpush3.bf16.msra.mxu0 %v1493_v1  ;;  %1293 = vmatpush3.bf16.msra.mxu1 %v1493_v1 }
   0x8   :  { %1295 = vmatprep.subr.msk.bf16.mxu0 %vm184_vm1, %v1494_v5  ;;  %1296 = vmatprep.subr.msk.bf16.mxu1 %vm184_vm1, %v1494_v5 }
   0x9   :  { %9 = vsyncpa [#allocation3], 0  ;;  %v36_v10 = vunpack.c.h.u8.bf16 %v19_v2  ;;  %v52_v11 = vunpack.c.h.u8.bf16 %v27_v4  ;;  %v37_v12 = vunpack.c.l.u8.bf16 %v20_v8  ;;  %v53_v13 = vunpack.c.l.u8.bf16 %v28_v9  ;;  %v21_v14 = vld [vmem:[%s2002_s0 + $0x10] sm:$0xff]  ;;  %v22_v20 = vld [vmem:[%s2002_s0 + $0x18] sm:$0xff] }
   0xa   :  { %v29_v15 = vld [vmem:[%s2002_s0 + $0x50] sm:$0xff]  ;;  %v38_v16 = vunpack.c.h.u8.bf16 %v20_v8  ;;  %v54_v17 = vunpack.c.h.u8.bf16 %v28_v9  ;;  %v39_v18 = vunpack.c.l.u8.bf16 %v21_v14  ;;  %v30_v21 = vld [vmem:[%s2002_s0 + $0x58] sm:$0xff]  ;;  %v40_v22 = vunpack.c.h.u8.bf16 %v21_v14  ;;  %v23_v26 = vld [vmem:[%s2002_s0 + $0x20] sm:$0xff] }
   0xb   :  { %1224 = vmatpush3.bf16.msra.mxu0 %v186_v7  ;;  %1294 = vmatpush3.bf16.msra.mxu1 %v186_v7  ;;  %v55_v19 = vunpack.c.l.u8.bf16 %v29_v15  ;;  %v56_v23 = vunpack.c.h.u8.bf16 %v29_v15  ;;  %v41_v24 = vunpack.c.l.u8.bf16 %v22_v20  ;;  %v57_v25 = vunpack.c.l.u8.bf16 %v30_v21  ;;  %v31_v27 = vld [vmem:[%s2002_s0 + $0x60] sm:$0xff]  ;;  %v24_v32 = vld [vmem:[%s2002_s0 + $0x28] sm:$0xff]  ;;  %v25_v38 = vld [vmem:[%s2002_s0 + $0x30] sm:$0xff] }
   0xc   :  { %v42_v28 = vunpack.c.h.u8.bf16 %v22_v20  ;;  %v58_v29 = vunpack.c.h.u8.bf16 %v30_v21  ;;  %v43_v30 = vunpack.c.l.u8.bf16 %v23_v26  ;;  %v59_v31 = vunpack.c.l.u8.bf16 %v31_v27  ;;  %v32_v33 = vld [vmem:[%s2002_s0 + $0x68] sm:$0xff]  ;;  %v33_v39 = vld [vmem:[%s2002_s0 + $0x70] sm:$0xff]  ;;  %v26_v44 = vld [vmem:[%s2002_s0 + $0x38] sm:$0xff] }
   0xd   :  { %v44_v34 = vunpack.c.h.u8.bf16 %v23_v26  ;;  %v60_v35 = vunpack.c.h.u8.bf16 %v31_v27  ;;  %v45_v36 = vunpack.c.l.u8.bf16 %v24_v32  ;;  %v61_v37 = vunpack.c.l.u8.bf16 %v32_v33  ;;  %v34_v45 = vld [vmem:[%s2002_s0 + $0x78] sm:$0xff]  ;;  %v1641_v52 = vld [vmem:[%s2004_s2] ss:$0 sm:$0xff] }
   0xe   :  { %1226 = vmatmul.mubr.msk.bf16.vlgmr.msra.gmra.mrb[0].mxu0 %vm87_vm0, %v36_v10  ;;  %1258 = vmatmul.mubr.msk.bf16.vlgmr.msra.gmra.mrb[0].mxu1 %vm87_vm0, %v52_v11  ;;  %v46_v40 = vunpack.c.h.u8.bf16 %v24_v32  ;;  %v62_v41 = vunpack.c.h.u8.bf16 %v32_v33  ;;  %v47_v42 = vunpack.c.l.u8.bf16 %v25_v38  ;;  %v63_v43 = vunpack.c.l.u8.bf16 %v33_v39  ;;  %v1648_v59 = vld [vmem:[%s2005_s3] ss:$0 sm:$0xff] }
   0xf   :  { %1229 = vmatprep.mubr.msk.bf16.mxu0 %vm87_vm0, %v37_v12  ;;  %1261 = vmatprep.mubr.msk.bf16.mxu1 %vm87_vm0, %v53_v13  ;;  %v48_v46 = vunpack.c.h.u8.bf16 %v25_v38  ;;  %v64_v47 = vunpack.c.h.u8.bf16 %v33_v39  ;;  %v49_v48 = vunpack.c.l.u8.bf16 %v26_v44  ;;  %v65_v49 = vunpack.c.l.u8.bf16 %v34_v45 }
  0x10   :  { %v50_v50 = vunpack.c.h.u8.bf16 %v26_v44  ;;  %v66_v51 = vunpack.c.h.u8.bf16 %v34_v45 }
  0x16   :  { %1230 = vmatmul.mubr.msk.bf16.gmra.mrb[4].mxu0 %vm87_vm0, %v38_v16  ;;  %1262 = vmatmul.mubr.msk.bf16.gmra.mrb[4].mxu1 %vm87_vm0, %v54_v17 }
  0x17   :  { %1233 = vmatprep.mubr.msk.bf16.mxu0 %vm87_vm0, %v39_v18  ;;  %1265 = vmatprep.mubr.msk.bf16.mxu1 %vm87_vm0, %v55_v19 }
  0x1e   :  { %1234 = vmatmul.mubr.msk.bf16.gmra.mrb[8].mxu0 %vm87_vm0, %v40_v22  ;;  %1266 = vmatmul.mubr.msk.bf16.gmra.mrb[8].mxu1 %vm87_vm0, %v56_v23 }
  0x1f   :  { %1237 = vmatprep.mubr.msk.bf16.mxu0 %vm87_vm0, %v41_v24  ;;  %1269 = vmatprep.mubr.msk.bf16.mxu1 %vm87_vm0, %v57_v25 }
  0x26   :  { %1238 = vmatmul.mubr.msk.bf16.gmra.mrb[12].mxu0 %vm87_vm0, %v42_v28  ;;  %1270 = vmatmul.mubr.msk.bf16.gmra.mrb[12].mxu1 %vm87_vm0, %v58_v29 }
  0x27   :  { %1241 = vmatprep.mubr.msk.bf16.mxu0 %vm87_vm0, %v43_v30  ;;  %1273 = vmatprep.mubr.msk.bf16.mxu1 %vm87_vm0, %v59_v31 }
  0x2e   :  { %1242 = vmatmul.mubr.msk.bf16.gmra.mrb[16].mxu0 %vm87_vm0, %v44_v34  ;;  %1274 = vmatmul.mubr.msk.bf16.gmra.mrb[16].mxu1 %vm87_vm0, %v60_v35 }
  0x2f   :  { %1245 = vmatprep.mubr.msk.bf16.mxu0 %vm87_vm0, %v45_v36  ;;  %1277 = vmatprep.mubr.msk.bf16.mxu1 %vm87_vm0, %v61_v37 }
  0x36   :  { %1246 = vmatmul.mubr.msk.bf16.gmra.mrb[20].mxu0 %vm87_vm0, %v46_v40  ;;  %1278 = vmatmul.mubr.msk.bf16.gmra.mrb[20].mxu1 %vm87_vm0, %v62_v41 }
  0x37   :  { %1249 = vmatprep.mubr.msk.bf16.mxu0 %vm87_vm0, %v47_v42  ;;  %1281 = vmatprep.mubr.msk.bf16.mxu1 %vm87_vm0, %v63_v43 }
  0x3e   :  { %1250 = vmatmul.mubr.msk.bf16.gmra.mrb[24].mxu0 %vm87_vm0, %v48_v46  ;;  %1282 = vmatmul.mubr.msk.bf16.gmra.mrb[24].mxu1 %vm87_vm0, %v64_v47 }
  0x3f   :  { %1253 = vmatprep.mubr.msk.bf16.mxu0 %vm87_vm0, %v49_v48  ;;  %1285 = vmatprep.mubr.msk.bf16.mxu1 %vm87_vm0, %v65_v49 }
  0x46   :  { %1254 = vmatmul.mubr.msk.bf16.gmra.mrb[28].mxu0 %vm87_vm0, %v50_v50  ;;  %1286 = vmatmul.mubr.msk.bf16.gmra.mrb[28].mxu1 %vm87_vm0, %v66_v51 }
  0xe1   :  { %v1227_v53 = vpop.f32.mrb[0].mxu0  ;;  %v1259_v54 = vpop.f32.mrb[0].mxu1 }
  0xe2   :  { %v486_v55 = vsub.f32 %v1227_v53, %v1641_v52  ;;  %v518_v56 = vsub.f32 %v1259_v54, %v1641_v52  ;;  %v222_v57 = vpop.f32.mrb[1].mxu0  ;;  %v350_v58 = vpop.f32.mrb[1].mxu1 }
  0xe3   :  { %v484_v60 = vsub.f32 %v222_v57, %v1641_v52  ;;  %v516_v61 = vsub.f32 %v350_v58, %v1641_v52  ;;  %v1228_v62 = vpop.f32.mrb[2].mxu0  ;;  %v1260_v63 = vpop.f32.mrb[2].mxu1 }
  0xe4   :  { %v550_v0 = vmul.f32 0.001, %v486_v55  ;;  %v582_v1 = vmul.f32 0.001, %v518_v56  ;;  %v487_v2 = vsub.f32 %v1228_v62, %v1641_v52  ;;  %v519_v3 = vsub.f32 %v1260_v63, %v1641_v52  ;;  %v225_v4 = vpop.f32.mrb[3].mxu0  ;;  %v353_v5 = vpop.f32.mrb[3].mxu1 }
  0xe5   :  { %v548_v6 = vmul.f32 0.001, %v484_v60  ;;  %v580_v7 = vmul.f32 0.001, %v516_v61  ;;  %v485_v8 = vsub.f32 %v225_v4, %v1641_v52  ;;  %v517_v9 = vsub.f32 %v353_v5, %v1641_v52 }
  0xe6   :  { %v621_v10 = vadd.f32 %v1648_v59, %v550_v0  ;;  %v653_v11 = vadd.f32 %v1648_v59, %v582_v1  ;;  %v551_v12 = vmul.f32 0.001, %v487_v2  ;;  %v583_v13 = vmul.f32 0.001, %v519_v3 }
  0xe7   :  { %v619_v14 = vadd.f32 %v1648_v59, %v548_v6  ;;  %v651_v15 = vadd.f32 %v1648_v59, %v580_v7  ;;  %v549_v16 = vmul.f32 0.001, %v485_v8  ;;  %v581_v17 = vmul.f32 0.001, %v517_v9 }
  0xe8   :  { %v685_v18 = vmul.f32 4.0, %v621_v10  ;;  %v717_v19 = vmul.f32 4.0, %v653_v11  ;;  %v622_v20 = vadd.f32 %v1648_v59, %v551_v12  ;;  %v654_v21 = vadd.f32 %v1648_v59, %v583_v13 }
  0xe9   :  { %v683_v22 = vmul.f32 4.0, %v619_v14  ;;  %v715_v23 = vmul.f32 4.0, %v651_v15  ;;  %v620_v24 = vadd.f32 %v1648_v59, %v549_v16  ;;  %v652_v25 = vadd.f32 %v1648_v59, %v581_v17  ;;  %v1664_v26 = vpop.f32.mrb[4].mxu0  ;;  %v1666_v27 = vpop.f32.mrb[4].mxu1 }
  0xea   :  { %v1299_v28 = vround.rtne.f32 %v685_v18  ;;  %v1331_v29 = vround.rtne.f32 %v717_v19  ;;  %v686_v30 = vmul.f32 4.0, %v622_v20  ;;  %v718_v31 = vmul.f32 4.0, %v654_v21  ;;  %v1668_v32 = vpop.f32.mrb[5].mxu0  ;;  %v1670_v33 = vpop.f32.mrb[5].mxu1 }
  0xeb   :  { %v1297_v34 = vround.rtne.f32 %v683_v22  ;;  %v1329_v35 = vround.rtne.f32 %v715_v23  ;;  %v684_v36 = vmul.f32 4.0, %v620_v24  ;;  %v716_v37 = vmul.f32 4.0, %v652_v25  ;;  %v1672_v38 = vpop.f32.mrb[6].mxu0  ;;  %v1674_v39 = vpop.f32.mrb[6].mxu1 }
  0xec   :  { %v813_v40 = vadd.f32 64.0, %v1299_v28  ;;  %v845_v41 = vadd.f32 64.0, %v1331_v29  ;;  %v1300_v42 = vround.rtne.f32 %v686_v30  ;;  %v1332_v43 = vround.rtne.f32 %v718_v31  ;;  %v1676_v44 = vpop.f32.mrb[7].mxu0  ;;  %v1678_v45 = vpop.f32.mrb[7].mxu1 }
  0xed   :  { %v811_v46 = vadd.f32 64.0, %v1297_v34  ;;  %v843_v47 = vadd.f32 64.0, %v1329_v35  ;;  %v1298_v48 = vround.rtne.f32 %v684_v36  ;;  %v1330_v49 = vround.rtne.f32 %v716_v37 }
  0xee   :  { %v877_v50 = vmax.f32 %v813_v40, 0.0  ;;  %v909_v51 = vmax.f32 %v845_v41, 0.0  ;;  %v814_v53 = vadd.f32 64.0, %v1300_v42  ;;  %v846_v54 = vadd.f32 64.0, %v1332_v43 }
  0xef   :  { %v875_v55 = vmax.f32 %v811_v46, 0.0  ;;  %v907_v56 = vmax.f32 %v843_v47, 0.0  ;;  %v812_v57 = vadd.f32 64.0, %v1298_v48  ;;  %v844_v58 = vadd.f32 64.0, %v1330_v49 }
  0xf0   :  { %v941_v60 = vmin.f32 %v877_v50, 255.0  ;;  %v973_v61 = vmin.f32 %v909_v51, 255.0  ;;  %v878_v62 = vmax.f32 %v814_v53, 0.0  ;;  %v910_v63 = vmax.f32 %v846_v54, 0.0 }
  0xf1   :  { %v939_v0 = vmin.f32 %v875_v55, 255.0  ;;  %v971_v1 = vmin.f32 %v907_v56, 255.0  ;;  %v876_v2 = vmax.f32 %v812_v57, 0.0  ;;  %v908_v3 = vmax.f32 %v844_v58, 0.0  ;;  %v1680_v4 = vpop.f32.mrb[8].mxu0  ;;  %v1682_v5 = vpop.f32.mrb[8].mxu1 }
  0xf2   :  { %v1365_v6 = vtrunc.f32 %v941_v60  ;;  %v1429_v7 = vtrunc.f32 %v973_v61  ;;  %v942_v8 = vmin.f32 %v878_v62, 255.0  ;;  %v974_v9 = vmin.f32 %v910_v63, 255.0  ;;  %v1684_v10 = vpop.f32.mrb[9].mxu0  ;;  %v1686_v11 = vpop.f32.mrb[9].mxu1 }
  0xf3   :  { %v1361_v12 = vtrunc.f32 %v939_v0  ;;  %v1425_v13 = vtrunc.f32 %v971_v1  ;;  %v940_v14 = vmin.f32 %v876_v2, 255.0  ;;  %v972_v15 = vmin.f32 %v908_v3, 255.0  ;;  %v1688_v16 = vpop.f32.mrb[10].mxu0  ;;  %v1690_v17 = vpop.f32.mrb[10].mxu1 }
  0xf4   :  { %v1366_v18 = vcvt.f32.s32 %v1365_v6  ;;  %v1430_v19 = vcvt.f32.s32 %v1429_v7  ;;  %v1367_v20 = vtrunc.f32 %v942_v8  ;;  %v1431_v21 = vtrunc.f32 %v974_v9  ;;  %v1692_v22 = vpop.f32.mrb[11].mxu0  ;;  %v1694_v23 = vpop.f32.mrb[11].mxu1 }
  0xf5   :  { %v1362_v24 = vcvt.f32.s32 %v1361_v12  ;;  %v1426_v25 = vcvt.f32.s32 %v1425_v13  ;;  %v1363_v28 = vtrunc.f32 %v940_v14  ;;  %v1427_v29 = vtrunc.f32 %v972_v15 }
  0xf6   :  { %v1368_v30 = vcvt.f32.s32 %v1367_v20  ;;  %v1432_v31 = vcvt.f32.s32 %v1431_v21  ;;  %v490_v34 = vsub.f32 %v1664_v26, %v1641_v52  ;;  %v522_v35 = vsub.f32 %v1666_v27, %v1641_v52 }
  0xf7   :  { %v1364_v36 = vcvt.f32.s32 %v1363_v28  ;;  %v1428_v37 = vcvt.f32.s32 %v1427_v29  ;;  %v488_v40 = vsub.f32 %v1668_v32, %v1641_v52  ;;  %v520_v41 = vsub.f32 %v1670_v33, %v1641_v52 }
  0xf8   :  { %v1068_v42 = vpack.c.b16 %v1368_v30, %v1366_v18  ;;  %v1092_v43 = vpack.c.b16 %v1432_v31, %v1430_v19  ;;  %v554_v46 = vmul.f32 0.001, %v490_v34  ;;  %v586_v47 = vmul.f32 0.001, %v522_v35 }
  0xf9   :  { %v1067_v48 = vpack.c.b16 %v1364_v36, %v1362_v24  ;;  %v1091_v49 = vpack.c.b16 %v1428_v37, %v1426_v25  ;;  %v552_v50 = vmul.f32 0.001, %v488_v40  ;;  %v584_v51 = vmul.f32 0.001, %v520_v41  ;;  %v1704_v26 = vpop.f32.mrb[12].mxu0  ;;  %v1706_v53 = vpop.f32.mrb[12].mxu1 }
  0xfa   :  { %v625_v27 = vadd.f32 %v1648_v59, %v554_v46  ;;  %v657_v54 = vadd.f32 %v1648_v59, %v586_v47  ;;  %v491_v32 = vsub.f32 %v1672_v38, %v1641_v52  ;;  %v523_v33 = vsub.f32 %v1674_v39, %v1641_v52  ;;  %v1714_v55 = vpop.f32.mrb[13].mxu0  ;;  %v1716_v56 = vpop.f32.mrb[13].mxu1 }
  0xfb   :  { %v1069_v57 = vpack.c.b8 %v1068_v42, %v1067_v48  ;;  %v1093_v58 = vpack.c.b8 %v1092_v43, %v1091_v49  ;;  %v623_v60 = vadd.f32 %v1648_v59, %v552_v50  ;;  %v655_v61 = vadd.f32 %v1648_v59, %v584_v51  ;;  %v1720_v62 = vpop.f32.mrb[14].mxu0  ;;  %v1722_v63 = vpop.f32.mrb[14].mxu1 }
  0xfc   :  { %v689_v0 = vmul.f32 4.0, %v625_v27  ;;  %v721_v1 = vmul.f32 4.0, %v657_v54  ;;  %v555_v38 = vmul.f32 0.001, %v491_v32  ;;  %v587_v2 = vmul.f32 0.001, %v523_v33 }
  0xfd   :  { %1115 = vst [vmem:[#allocation2] sm:$0xff] %v1069_v57  ;;  %1123 = vst [vmem:[#allocation2 + $0x40] sm:$0xff] %v1093_v58  ;;  %v687_v39 = vmul.f32 4.0, %v623_v60  ;;  %v719_v3 = vmul.f32 4.0, %v655_v61  ;;  %v489_v6 = vsub.f32 %v1676_v44, %v1641_v52  ;;  %v521_v7 = vsub.f32 %v1678_v45, %v1641_v52  ;;  %v1728_v8 = vpop.f32.mrb[15].mxu0  ;;  %v1730_v9 = vpop.f32.mrb[15].mxu1 }
  0xfe   :  { %v1303_v12 = vround.rtne.f32 %v689_v0  ;;  %v1335_v13 = vround.rtne.f32 %v721_v1  ;;  %v626_v14 = vadd.f32 %v1648_v59, %v555_v38  ;;  %v658_v15 = vadd.f32 %v1648_v59, %v587_v2 }
  0xff   :  { %v1301_v18 = vround.rtne.f32 %v687_v39  ;;  %v1333_v19 = vround.rtne.f32 %v719_v3  ;;  %v553_v20 = vmul.f32 0.001, %v489_v6  ;;  %v585_v21 = vmul.f32 0.001, %v521_v7 }
 0x100   :  { %v817_v24 = vadd.f32 64.0, %v1303_v12  ;;  %v849_v25 = vadd.f32 64.0, %v1335_v13  ;;  %v690_v44 = vmul.f32 4.0, %v626_v14  ;;  %v722_v28 = vmul.f32 4.0, %v658_v15 }
 0x101   :  { %v815_v29 = vadd.f32 64.0, %v1301_v18  ;;  %v847_v45 = vadd.f32 64.0, %v1333_v19  ;;  %v624_v30 = vadd.f32 %v1648_v59, %v553_v20  ;;  %v656_v31 = vadd.f32 %v1648_v59, %v585_v21  ;;  %v1736_v34 = vpop.f32.mrb[16].mxu0  ;;  %v1738_v35 = vpop.f32.mrb[16].mxu1 }
 0x102   :  { %v881_v36 = vmax.f32 %v817_v24, 0.0  ;;  %v913_v37 = vmax.f32 %v849_v25, 0.0  ;;  %v1304_v40 = vround.rtne.f32 %v690_v44  ;;  %v1336_v41 = vround.rtne.f32 %v722_v28  ;;  %v1740_v42 = vpop.f32.mrb[17].mxu0  ;;  %v1742_v43 = vpop.f32.mrb[17].mxu1 }
 0x103   :  { %v879_v46 = vmax.f32 %v815_v29, 0.0  ;;  %v911_v47 = vmax.f32 %v847_v45, 0.0  ;;  %v688_v48 = vmul.f32 4.0, %v624_v30  ;;  %v720_v49 = vmul.f32 4.0, %v656_v31  ;;  %v1744_v50 = vpop.f32.mrb[18].mxu0  ;;  %v1746_v51 = vpop.f32.mrb[18].mxu1 }
 0x104   :  { %v945_v27 = vmin.f32 %v881_v36, 255.0  ;;  %v977_v54 = vmin.f32 %v913_v37, 255.0  ;;  %v818_v32 = vadd.f32 64.0, %v1304_v40  ;;  %v850_v33 = vadd.f32 64.0, %v1336_v41  ;;  %v1748_v57 = vpop.f32.mrb[19].mxu0  ;;  %v1750_v58 = vpop.f32.mrb[19].mxu1 }
 0x105   :  { %v943_v60 = vmin.f32 %v879_v46, 255.0  ;;  %v975_v61 = vmin.f32 %v911_v47, 255.0  ;;  %v1302_v0 = vround.rtne.f32 %v688_v48  ;;  %v1334_v1 = vround.rtne.f32 %v720_v49 }
 0x106   :  { %v1373_v38 = vtrunc.f32 %v945_v27  ;;  %v1437_v2 = vtrunc.f32 %v977_v54  ;;  %v882_v39 = vmax.f32 %v818_v32, 0.0  ;;  %v914_v3 = vmax.f32 %v850_v33, 0.0 }
 0x107   :  { %v1369_v6 = vtrunc.f32 %v943_v60  ;;  %v1433_v7 = vtrunc.f32 %v975_v61  ;;  %v816_v12 = vadd.f32 64.0, %v1302_v0  ;;  %v848_v13 = vadd.f32 64.0, %v1334_v1 }
 0x108   :  { %v1374_v14 = vcvt.f32.s32 %v1373_v38  ;;  %v1438_v15 = vcvt.f32.s32 %v1437_v2  ;;  %v946_v18 = vmin.f32 %v882_v39, 255.0  ;;  %v978_v19 = vmin.f32 %v914_v3, 255.0 }
 0x109   :  { %v1370_v20 = vcvt.f32.s32 %v1369_v6  ;;  %v1434_v21 = vcvt.f32.s32 %v1433_v7  ;;  %v880_v24 = vmax.f32 %v816_v12, 0.0  ;;  %v912_v25 = vmax.f32 %v848_v13, 0.0  ;;  %v1752_v44 = vpop.f32.mrb[20].mxu0  ;;  %v1754_v28 = vpop.f32.mrb[20].mxu1 }
 0x10a   :  { %v1375_v29 = vtrunc.f32 %v946_v18  ;;  %v1439_v45 = vtrunc.f32 %v978_v19  ;;  %v494_v30 = vsub.f32 %v1680_v4, %v1641_v52  ;;  %v526_v31 = vsub.f32 %v1682_v5, %v1641_v52  ;;  %v1760_v36 = vpop.f32.mrb[21].mxu0  ;;  %v1762_v37 = vpop.f32.mrb[21].mxu1 }
 0x10b   :  { %v944_v40 = vmin.f32 %v880_v24, 255.0  ;;  %v976_v41 = vmin.f32 %v912_v25, 255.0  ;;  %v492_v46 = vsub.f32 %v1684_v10, %v1641_v52  ;;  %v524_v47 = vsub.f32 %v1686_v11, %v1641_v52  ;;  %v1768_v48 = vpop.f32.mrb[22].mxu0  ;;  %v1770_v49 = vpop.f32.mrb[22].mxu1 }
 0x10c   :  { %v1376_v4 = vcvt.f32.s32 %v1375_v29  ;;  %v1440_v27 = vcvt.f32.s32 %v1439_v45  ;;  %v558_v54 = vmul.f32 0.001, %v494_v30  ;;  %v590_v5 = vmul.f32 0.001, %v526_v31  ;;  %v1772_v32 = vpop.f32.mrb[23].mxu0  ;;  %v1774_v33 = vpop.f32.mrb[23].mxu1 }
 0x10d   :  { %v1371_v60 = vtrunc.f32 %v944_v40  ;;  %v1435_v61 = vtrunc.f32 %v976_v41  ;;  %v556_v0 = vmul.f32 0.001, %v492_v46  ;;  %v588_v1 = vmul.f32 0.001, %v524_v47 }
 0x10e   :  { %v1071_v10 = vpack.c.b16 %v1376_v4, %v1374_v14  ;;  %v1095_v38 = vpack.c.b16 %v1440_v27, %v1438_v15  ;;  %v629_v11 = vadd.f32 %v1648_v59, %v558_v54  ;;  %v661_v2 = vadd.f32 %v1648_v59, %v590_v5 }
 0x10f   :  { %v1372_v39 = vcvt.f32.s32 %v1371_v60  ;;  %v1436_v3 = vcvt.f32.s32 %v1435_v61  ;;  %v627_v6 = vadd.f32 %v1648_v59, %v556_v0  ;;  %v659_v7 = vadd.f32 %v1648_v59, %v588_v1 }
 0x110   :  { %v693_v12 = vmul.f32 4.0, %v629_v11  ;;  %v725_v13 = vmul.f32 4.0, %v661_v2  ;;  %v495_v18 = vsub.f32 %v1688_v16, %v1641_v52  ;;  %v527_v19 = vsub.f32 %v1690_v17, %v1641_v52 }
 0x111   :  { %v1070_v14 = vpack.c.b16 %v1372_v39, %v1370_v20  ;;  %v1094_v15 = vpack.c.b16 %v1436_v3, %v1434_v21  ;;  %v691_v24 = vmul.f32 4.0, %v627_v6  ;;  %v723_v25 = vmul.f32 4.0, %v659_v7  ;;  %v1784_v29 = vpop.f32.mrb[24].mxu0  ;;  %v1786_v45 = vpop.f32.mrb[24].mxu1 }
 0x112   :  { %v1307_v30 = vround.rtne.f32 %v693_v12  ;;  %v1339_v31 = vround.rtne.f32 %v725_v13  ;;  %v559_v40 = vmul.f32 0.001, %v495_v18  ;;  %v591_v41 = vmul.f32 0.001, %v527_v19  ;;  %v1788_v46 = vpop.f32.mrb[25].mxu0  ;;  %v1790_v47 = vpop.f32.mrb[25].mxu1 }
 0x113   :  { %v1072_v16 = vpack.c.b8 %v1071_v10, %v1070_v14  ;;  %v1096_v4 = vpack.c.b8 %v1095_v38, %v1094_v15  ;;  %v1305_v27 = vround.rtne.f32 %v691_v24  ;;  %v1337_v17 = vround.rtne.f32 %v723_v25  ;;  %v1792_v20 = vpop.f32.mrb[26].mxu0  ;;  %v1794_v21 = vpop.f32.mrb[26].mxu1 }
 0x114   :  { %v821_v54 = vadd.f32 64.0, %v1307_v30  ;;  %v853_v5 = vadd.f32 64.0, %v1339_v31  ;;  %v630_v60 = vadd.f32 %v1648_v59, %v559_v40  ;;  %v662_v61 = vadd.f32 %v1648_v59, %v591_v41  ;;  %v1798_v0 = vpop.f32.mrb[27].mxu0  ;;  %v1800_v1 = vpop.f32.mrb[27].mxu1 }
 0x115   :  { %1116 = vst [vmem:[#allocation2 + $0x8] sm:$0xff] %v1072_v16  ;;  %1124 = vst [vmem:[#allocation2 + $0x48] sm:$0xff] %v1096_v4  ;;  %v819_v10 = vadd.f32 64.0, %v1305_v27  ;;  %v851_v38 = vadd.f32 64.0, %v1337_v17  ;;  %v493_v11 = vsub.f32 %v1692_v22, %v1641_v52  ;;  %v525_v2 = vsub.f32 %v1694_v23, %v1641_v52 }
 0x116   :  { %v885_v39 = vmax.f32 %v821_v54, 0.0  ;;  %v917_v3 = vmax.f32 %v853_v5, 0.0  ;;  %v694_v6 = vmul.f32 4.0, %v630_v60  ;;  %v726_v7 = vmul.f32 4.0, %v662_v61 }
 0x117   :  { %v883_v12 = vmax.f32 %v819_v10, 0.0  ;;  %v915_v13 = vmax.f32 %v851_v38, 0.0  ;;  %v557_v18 = vmul.f32 0.001, %v493_v11  ;;  %v589_v19 = vmul.f32 0.001, %v525_v2 }
 0x118   :  { %v949_v14 = vmin.f32 %v885_v39, 255.0  ;;  %v981_v15 = vmin.f32 %v917_v3, 255.0  ;;  %v1308_v24 = vround.rtne.f32 %v694_v6  ;;  %v1340_v25 = vround.rtne.f32 %v726_v7 }
 0x119   :  { %v947_v30 = vmin.f32 %v883_v12, 255.0  ;;  %v979_v31 = vmin.f32 %v915_v13, 255.0  ;;  %v628_v40 = vadd.f32 %v1648_v59, %v557_v18  ;;  %v660_v22 = vadd.f32 %v1648_v59, %v589_v19  ;;  %v1808_v41 = vpop.f32.mrb[28].mxu0  ;;  %v1810_v23 = vpop.f32.mrb[28].mxu1 }
 0x11a   :  { %v1381_v16 = vtrunc.f32 %v949_v14  ;;  %v1445_v4 = vtrunc.f32 %v981_v15  ;;  %v822_v27 = vadd.f32 64.0, %v1308_v24  ;;  %v854_v17 = vadd.f32 64.0, %v1340_v25  ;;  %v1812_v54 = vpop.f32.mrb[29].mxu0  ;;  %v1814_v5 = vpop.f32.mrb[29].mxu1 }
 0x11b   :  { %v1377_v60 = vtrunc.f32 %v947_v30  ;;  %v1441_v61 = vtrunc.f32 %v979_v31  ;;  %v692_v10 = vmul.f32 4.0, %v628_v40  ;;  %v724_v38 = vmul.f32 4.0, %v660_v22  ;;  %v1816_v11 = vpop.f32.mrb[30].mxu0  ;;  %v1818_v2 = vpop.f32.mrb[30].mxu1 }
 0x11c   :  { %v1820_v39 = vcvt.f32.s32 %v1381_v16  ;;  %v1822_v3 = vcvt.f32.s32 %v1445_v4  ;;  %v886_v6 = vmax.f32 %v822_v27, 0.0  ;;  %v918_v7 = vmax.f32 %v854_v17, 0.0  ;;  %v1824_v12 = vpop.f32.mrb[31].mxu0  ;;  %v1826_v13 = vpop.f32.mrb[31].mxu1 }
 0x11d   :  { %2007 = vst [vmem:[#allocation5_spill] sm:$0xff] %v1824_v12  ;;  %2008 = vst [vmem:[#allocation6_spill] sm:$0xff] %v1826_v13  ;;  %v1378_v18 = vcvt.f32.s32 %v1377_v60  ;;  %v1442_v19 = vcvt.f32.s32 %v1441_v61  ;;  %v1306_v14 = vround.rtne.f32 %v692_v10  ;;  %v1338_v15 = vround.rtne.f32 %v724_v38 }
 0x11e   :  { %v950_v24 = vmin.f32 %v886_v6, 255.0  ;;  %v982_v25 = vmin.f32 %v918_v7, 255.0  ;;  %v498_v30 = vsub.f32 %v1704_v26, %v1641_v52  ;;  %v530_v31 = vsub.f32 %v1706_v53, %v1641_v52 }
 0x11f   :  { %v820_v40 = vadd.f32 64.0, %v1306_v14  ;;  %v852_v22 = vadd.f32 64.0, %v1338_v15  ;;  %v496_v16 = vsub.f32 %v1714_v55, %v1641_v52  ;;  %v528_v4 = vsub.f32 %v1716_v56, %v1641_v52 }
 0x120   :  { %v1383_v27 = vtrunc.f32 %v950_v24  ;;  %v1447_v17 = vtrunc.f32 %v982_v25  ;;  %v562_v60 = vmul.f32 0.001, %v498_v30  ;;  %v594_v61 = vmul.f32 0.001, %v530_v31 }
 0x121   :  { %v884_v10 = vmax.f32 %v820_v40, 0.0  ;;  %v916_v38 = vmax.f32 %v852_v22, 0.0  ;;  %v560_v6 = vmul.f32 0.001, %v496_v16  ;;  %v592_v7 = vmul.f32 0.001, %v528_v4 }
 0x122   :  { %v1384_v26 = vcvt.f32.s32 %v1383_v27  ;;  %v1448_v13 = vcvt.f32.s32 %v1447_v17  ;;  %v633_v53 = vadd.f32 %v1648_v59, %v562_v60  ;;  %v665_v14 = vadd.f32 %v1648_v59, %v594_v61 }
 0x123   :  { %v948_v15 = vmin.f32 %v884_v10, 255.0  ;;  %v980_v12 = vmin.f32 %v916_v38, 255.0  ;;  %v631_v55 = vadd.f32 %v1648_v59, %v560_v6  ;;  %v663_v56 = vadd.f32 %v1648_v59, %v592_v7 }
 0x124   :  { %v1074_v24 = vpack.c.b16 %v1384_v26, %v1820_v39  ;;  %v1098_v25 = vpack.c.b16 %v1448_v13, %v1822_v3  ;;  %v697_v30 = vmul.f32 4.0, %v633_v53  ;;  %v729_v31 = vmul.f32 4.0, %v665_v14 }
 0x125   :  { %v1379_v40 = vtrunc.f32 %v948_v15  ;;  %v1443_v22 = vtrunc.f32 %v980_v12  ;;  %v695_v16 = vmul.f32 4.0, %v631_v55  ;;  %v727_v4 = vmul.f32 4.0, %v663_v56 }
 0x126   :  { %v1311_v27 = vround.rtne.f32 %v697_v30  ;;  %v1343_v17 = vround.rtne.f32 %v729_v31  ;;  %v499_v60 = vsub.f32 %v1720_v62, %v1641_v52  ;;  %v531_v61 = vsub.f32 %v1722_v63, %v1641_v52 }
 0x127   :  { %v1380_v10 = vcvt.f32.s32 %v1379_v40  ;;  %v1444_v38 = vcvt.f32.s32 %v1443_v22  ;;  %v1309_v6 = vround.rtne.f32 %v695_v16  ;;  %v1341_v39 = vround.rtne.f32 %v727_v4 }
 0x128   :  { %v825_v7 = vadd.f32 64.0, %v1311_v27  ;;  %v857_v3 = vadd.f32 64.0, %v1343_v17  ;;  %v563_v13 = vmul.f32 0.001, %v499_v60  ;;  %v595_v26 = vmul.f32 0.001, %v531_v61 }
 0x129   :  { %v1073_v53 = vpack.c.b16 %v1380_v10, %v1378_v18  ;;  %v1097_v12 = vpack.c.b16 %v1444_v38, %v1442_v19  ;;  %v823_v14 = vadd.f32 64.0, %v1309_v6  ;;  %v855_v15 = vadd.f32 64.0, %v1341_v39 }
 0x12a   :  { %v889_v55 = vmax.f32 %v825_v7, 0.0  ;;  %v921_v56 = vmax.f32 %v857_v3, 0.0  ;;  %v634_v30 = vadd.f32 %v1648_v59, %v563_v13  ;;  %v666_v62 = vadd.f32 %v1648_v59, %v595_v26 }
 0x12b   :  { %v1075_v31 = vpack.c.b8 %v1074_v24, %v1073_v53  ;;  %v1099_v63 = vpack.c.b8 %v1098_v25, %v1097_v12  ;;  %v887_v40 = vmax.f32 %v823_v14, 0.0  ;;  %v919_v22 = vmax.f32 %v855_v15, 0.0 }
 0x12c   :  { %v953_v16 = vmin.f32 %v889_v55, 255.0  ;;  %v985_v4 = vmin.f32 %v921_v56, 255.0  ;;  %v698_v27 = vmul.f32 4.0, %v634_v30  ;;  %v730_v17 = vmul.f32 4.0, %v666_v62 }
 0x12d   :  { %1117 = vst [vmem:[#allocation2 + $0x10] sm:$0xff] %v1075_v31  ;;  %1125 = vst [vmem:[#allocation2 + $0x50] sm:$0xff] %v1099_v63  ;;  %v951_v18 = vmin.f32 %v887_v40, 255.0  ;;  %v983_v19 = vmin.f32 %v919_v22, 255.0  ;;  %v497_v60 = vsub.f32 %v1728_v8, %v1641_v52  ;;  %v529_v61 = vsub.f32 %v1730_v9, %v1641_v52 }
 0x12e   :  { %v1389_v10 = vtrunc.f32 %v953_v16  ;;  %v1453_v38 = vtrunc.f32 %v985_v4  ;;  %v1312_v24 = vround.rtne.f32 %v698_v27  ;;  %v1344_v25 = vround.rtne.f32 %v730_v17 }
 0x12f   :  { %v1385_v6 = vtrunc.f32 %v951_v18  ;;  %v1449_v39 = vtrunc.f32 %v983_v19  ;;  %v561_v7 = vmul.f32 0.001, %v497_v60  ;;  %v593_v3 = vmul.f32 0.001, %v529_v61 }
 0x130   :  { %v1852_v13 = vcvt.f32.s32 %v1389_v10  ;;  %v1854_v26 = vcvt.f32.s32 %v1453_v38  ;;  %v826_v53 = vadd.f32 64.0, %v1312_v24  ;;  %v858_v12 = vadd.f32 64.0, %v1344_v25 }
 0x131   :  { %v1856_v14 = vcvt.f32.s32 %v1385_v6  ;;  %v1858_v8 = vcvt.f32.s32 %v1449_v39  ;;  %v632_v9 = vadd.f32 %v1648_v59, %v561_v7  ;;  %v664_v15 = vadd.f32 %v1648_v59, %v593_v3 }
 0x132   :  { %v890_v55 = vmax.f32 %v826_v53, 0.0  ;;  %v922_v56 = vmax.f32 %v858_v12, 0.0  ;;  %v502_v30 = vsub.f32 %v1736_v34, %v1641_v52  ;;  %v534_v62 = vsub.f32 %v1738_v35, %v1641_v52 }
 0x133   :  { %v696_v31 = vmul.f32 4.0, %v632_v9  ;;  %v728_v63 = vmul.f32 4.0, %v664_v15  ;;  %v500_v40 = vsub.f32 %v1740_v42, %v1641_v52  ;;  %v532_v22 = vsub.f32 %v1742_v43, %v1641_v52 }
 0x134   :  { %v954_v16 = vmin.f32 %v890_v55, 255.0  ;;  %v986_v4 = vmin.f32 %v922_v56, 255.0  ;;  %v566_v27 = vmul.f32 0.001, %v502_v30  ;;  %v598_v17 = vmul.f32 0.001, %v534_v62 }
 0x135   :  { %v1310_v18 = vround.rtne.f32 %v696_v31  ;;  %v1342_v19 = vround.rtne.f32 %v728_v63  ;;  %v564_v60 = vmul.f32 0.001, %v500_v40  ;;  %v596_v61 = vmul.f32 0.001, %v532_v22 }
 0x136   :  { %v1391_v34 = vtrunc.f32 %v954_v16  ;;  %v1455_v10 = vtrunc.f32 %v986_v4  ;;  %v637_v35 = vadd.f32 %v1648_v59, %v566_v27  ;;  %v669_v38 = vadd.f32 %v1648_v59, %v598_v17 }
 0x137   :  { %v824_v24 = vadd.f32 64.0, %v1310_v18  ;;  %v856_v25 = vadd.f32 64.0, %v1342_v19  ;;  %v635_v42 = vadd.f32 %v1648_v59, %v564_v60  ;;  %v667_v43 = vadd.f32 %v1648_v59, %v596_v61 }
 0x138   :  { %v1392_v6 = vcvt.f32.s32 %v1391_v34  ;;  %v1456_v39 = vcvt.f32.s32 %v1455_v10  ;;  %v701_v7 = vmul.f32 4.0, %v637_v35  ;;  %v733_v3 = vmul.f32 4.0, %v669_v38 }
 0x139   :  { %v888_v53 = vmax.f32 %v824_v24, 0.0  ;;  %v920_v12 = vmax.f32 %v856_v25, 0.0  ;;  %v699_v9 = vmul.f32 4.0, %v635_v42  ;;  %v731_v15 = vmul.f32 4.0, %v667_v43 }
 0x13a   :  { %v1077_v55 = vpack.c.b16 %v1392_v6, %v1852_v13  ;;  %v1101_v56 = vpack.c.b16 %v1456_v39, %v1854_v26  ;;  %v1315_v30 = vround.rtne.f32 %v701_v7  ;;  %v1347_v62 = vround.rtne.f32 %v733_v3 }
 0x13b   :  { %v952_v31 = vmin.f32 %v888_v53, 255.0  ;;  %v984_v63 = vmin.f32 %v920_v12, 255.0  ;;  %v1313_v40 = vround.rtne.f32 %v699_v9  ;;  %v1345_v22 = vround.rtne.f32 %v731_v15 }
 0x13c   :  { %v829_v16 = vadd.f32 64.0, %v1315_v30  ;;  %v861_v4 = vadd.f32 64.0, %v1347_v62  ;;  %v503_v27 = vsub.f32 %v1744_v50, %v1641_v52  ;;  %v535_v17 = vsub.f32 %v1746_v51, %v1641_v52 }
 0x13d   :  { %v1387_v18 = vtrunc.f32 %v952_v31  ;;  %v1451_v19 = vtrunc.f32 %v984_v63  ;;  %v827_v60 = vadd.f32 64.0, %v1313_v40  ;;  %v859_v13 = vadd.f32 64.0, %v1345_v22 }
 0x13e   :  { %v893_v61 = vmax.f32 %v829_v16, 0.0  ;;  %v925_v26 = vmax.f32 %v861_v4, 0.0  ;;  %v567_v34 = vmul.f32 0.001, %v503_v27  ;;  %v599_v10 = vmul.f32 0.001, %v535_v17 }
 0x13f   :  { %v1388_v35 = vcvt.f32.s32 %v1387_v18  ;;  %v1452_v38 = vcvt.f32.s32 %v1451_v19  ;;  %v891_v24 = vmax.f32 %v827_v60, 0.0  ;;  %v923_v25 = vmax.f32 %v859_v13, 0.0 }
 0x140   :  { %v957_v42 = vmin.f32 %v893_v61, 255.0  ;;  %v989_v43 = vmin.f32 %v925_v26, 255.0  ;;  %v638_v6 = vadd.f32 %v1648_v59, %v567_v34  ;;  %v670_v50 = vadd.f32 %v1648_v59, %v599_v10 }
 0x141   :  { %v1076_v51 = vpack.c.b16 %v1388_v35, %v1856_v14  ;;  %v1100_v39 = vpack.c.b16 %v1452_v38, %v1858_v8  ;;  %v1884_v30 = vmin.f32 %v891_v24, 255.0  ;;  %v1886_v62 = vmin.f32 %v923_v25, 255.0 }
 0x142   :  { %v1397_v7 = vtrunc.f32 %v957_v42  ;;  %v1461_v3 = vtrunc.f32 %v989_v43  ;;  %v702_v53 = vmul.f32 4.0, %v638_v6  ;;  %v734_v12 = vmul.f32 4.0, %v670_v50 }
 0x143   :  { %v1078_v9 = vpack.c.b8 %v1077_v55, %v1076_v51  ;;  %v1102_v15 = vpack.c.b8 %v1101_v56, %v1100_v39  ;;  %v501_v14 = vsub.f32 %v1748_v57, %v1641_v52  ;;  %v533_v8 = vsub.f32 %v1750_v58, %v1641_v52 }
 0x144   :  { %v1316_v31 = vround.rtne.f32 %v702_v53  ;;  %v1348_v63 = vround.rtne.f32 %v734_v12  ;;  %v1888_v40 = vcvt.f32.s32 %v1397_v7  ;;  %v1890_v22 = vcvt.f32.s32 %v1461_v3 }
 0x145   :  { %1118 = vst [vmem:[#allocation2 + $0x18] sm:$0xff] %v1078_v9  ;;  %1126 = vst [vmem:[#allocation2 + $0x58] sm:$0xff] %v1102_v15  ;;  %v506_v16 = vsub.f32 %v1752_v44, %v1641_v52  ;;  %v538_v4 = vsub.f32 %v1754_v28, %v1641_v52  ;;  %v565_v27 = vmul.f32 0.001, %v501_v14  ;;  %v597_v17 = vmul.f32 0.001, %v533_v8 }
 0x146   :  { %v830_v55 = vadd.f32 64.0, %v1316_v31  ;;  %v862_v56 = vadd.f32 64.0, %v1348_v63  ;;  %v504_v18 = vsub.f32 %v1760_v36, %v1641_v52  ;;  %v536_v19 = vsub.f32 %v1762_v37, %v1641_v52 }
 0x147   :  { %v570_v13 = vmul.f32 0.001, %v506_v16  ;;  %v602_v58 = vmul.f32 0.001, %v538_v4  ;;  %v636_v61 = vadd.f32 %v1648_v59, %v565_v27  ;;  %v668_v26 = vadd.f32 %v1648_v59, %v597_v17 }
 0x148   :  { %v894_v57 = vmax.f32 %v830_v55, 0.0  ;;  %v926_v60 = vmax.f32 %v862_v56, 0.0  ;;  %v568_v44 = vmul.f32 0.001, %v504_v18  ;;  %v600_v34 = vmul.f32 0.001, %v536_v19 }
 0x149   :  { %v641_v35 = vadd.f32 %v1648_v59, %v570_v13  ;;  %v673_v38 = vadd.f32 %v1648_v59, %v602_v58  ;;  %v700_v36 = vmul.f32 4.0, %v636_v61  ;;  %v732_v24 = vmul.f32 4.0, %v668_v26 }
 0x14a   :  { %v958_v10 = vmin.f32 %v894_v57, 255.0  ;;  %v990_v28 = vmin.f32 %v926_v60, 255.0  ;;  %v639_v52 = vadd.f32 %v1648_v59, %v568_v44  ;;  %v671_v37 = vadd.f32 %v1648_v59, %v600_v34  ;;  %v1915_v57 = vld [vmem:[%s2004_s2] ss:$0 sm:$0xff] }
 0x14b   :  { %v705_v43 = vmul.f32 4.0, %v641_v35  ;;  %v737_v6 = vmul.f32 4.0, %v673_v38  ;;  %v1314_v50 = vround.rtne.f32 %v700_v36  ;;  %v1346_v51 = vround.rtne.f32 %v732_v24 }
 0x14c   :  { %v1399_v25 = vtrunc.f32 %v958_v10  ;;  %v1463_v42 = vtrunc.f32 %v990_v28  ;;  %v703_v39 = vmul.f32 4.0, %v639_v52  ;;  %v735_v7 = vmul.f32 4.0, %v671_v37 }
 0x14d   :  { %v1319_v12 = vround.rtne.f32 %v705_v43  ;;  %v1351_v9 = vround.rtne.f32 %v737_v6  ;;  %v828_v15 = vadd.f32 64.0, %v1314_v50  ;;  %v860_v31 = vadd.f32 64.0, %v1346_v51 }
 0x14e   :  { %v1400_v3 = vcvt.f32.s32 %v1399_v25  ;;  %v1464_v53 = vcvt.f32.s32 %v1463_v42  ;;  %v1317_v63 = vround.rtne.f32 %v703_v39  ;;  %v1349_v14 = vround.rtne.f32 %v735_v7 }
 0x14f   :  { %v833_v55 = vadd.f32 64.0, %v1319_v12  ;;  %v865_v56 = vadd.f32 64.0, %v1351_v9  ;;  %v892_v16 = vmax.f32 %v828_v15, 0.0  ;;  %v924_v4 = vmax.f32 %v860_v31, 0.0 }
 0x150   :  { %v1080_v8 = vpack.c.b16 %v1400_v3, %v1888_v40  ;;  %v1104_v59 = vpack.c.b16 %v1464_v53, %v1890_v22  ;;  %v831_v27 = vadd.f32 64.0, %v1317_v63  ;;  %v863_v17 = vadd.f32 64.0, %v1349_v14 }
 0x151   :  { %v897_v18 = vmax.f32 %v833_v55, 0.0  ;;  %v929_v19 = vmax.f32 %v865_v56, 0.0  ;;  %v507_v60 = vsub.f32 %v1768_v48, %v1915_v57  ;;  %v539_v40 = vsub.f32 %v1770_v49, %v1915_v57  ;;  %v1926_v48 = vld [vmem:[%s2005_s3] ss:$0 sm:$0xff]  ;;  %s1521_s3 = smov [#allocation2]  }
 0x152   :  { %v1393_v22 = vtrunc.f32 %v1884_v30  ;;  %v1457_v13 = vtrunc.f32 %v1886_v62  ;;  %v956_v58 = vmin.f32 %v892_v16, 255.0  ;;  %v988_v61 = vmin.f32 %v924_v4, 255.0  ;;  %s1136_s5 = sshll.u32 %s1521_s3, 4  ;;  %s1137_s5 = int_to_ptr.vmem [resolvable:$true] %s1136_s5 }
 0x153   :  { %v895_v26 = vmax.f32 %v831_v27, 0.0  ;;  %v927_v44 = vmax.f32 %v863_v17, 0.0  ;;  %v571_v34 = vmul.f32 0.001, %v507_v60  ;;  %v603_v10 = vmul.f32 0.001, %v539_v40  ;;  %p1502_p1 = scmp.lt.s32.totalorder %s1137_s5, %s1137_s5 }
 0x154   :  { %v1395_v28 = vtrunc.f32 %v956_v58  ;;  %v1459_v35 = vtrunc.f32 %v988_v61  ;;  %v961_v38 = vmin.f32 %v897_v18, 255.0  ;;  %v993_v36 = vmin.f32 %v929_v19, 255.0  ;;  %s1497_s6 = scalar_lea.vmem %s1137_s5, 2048 }
 0x155   :  { %v642_v49 = vadd.f32 %v1926_v48, %v571_v34  ;;  %v674_v30 = vadd.f32 %v1926_v48, %v603_v10  ;;  %v1394_v62 = vcvt.f32.s32 %v1393_v22  ;;  %v1458_v24 = vcvt.f32.s32 %v1457_v13  ;;  %p1498_p0 = scmp.ne.s32.totalorder %s1137_s5, %s1497_s6  ;;  %p1503_p2 = scmp.lt.s32.totalorder %s1497_s6, %s1497_s6 }
 0x156   :  { %v1396_v52 = vcvt.f32.s32 %v1395_v28  ;;  %v1460_v37 = vcvt.f32.s32 %v1459_v35  ;;  %v1930_v25 = vmin.f32 %v895_v26, 255.0  ;;  %v1932_v42 = vmin.f32 %v927_v44, 255.0 }
 0x157   :  { %v706_v43 = vmul.f32 4.0, %v642_v49  ;;  %v738_v6 = vmul.f32 4.0, %v674_v30  ;;  %v1405_v39 = vtrunc.f32 %v961_v38  ;;  %v1469_v7 = vtrunc.f32 %v993_v36  ;;  %p1504_p3 = por %p1503_p2, %p1502_p1 }
 0x158   :  { %v1079_v50 = vpack.c.b16 %v1396_v52, %v1394_v62  ;;  %v1103_v51 = vpack.c.b16 %v1460_v37, %v1458_v24  ;;  %v505_v12 = vsub.f32 %v1772_v32, %v1915_v57  ;;  %v537_v9 = vsub.f32 %v1774_v33, %v1915_v57 }
 0x159   :  { %v1320_v3 = vround.rtne.f32 %v706_v43  ;;  %v1352_v53 = vround.rtne.f32 %v738_v6  ;;  %v510_v63 = vsub.f32 %v1784_v29, %v1915_v57  ;;  %v542_v14 = vsub.f32 %v1786_v45, %v1915_v57  ;;  %p1505_p4 = pnand %p1504_p3, %p1498_p0 }
 0x15a   :  { %v1081_v15 = vpack.c.b8 %v1080_v8, %v1079_v50  ;;  %v1105_v31 = vpack.c.b8 %v1104_v59, %v1103_v51  ;;  %v569_v16 = vmul.f32 0.001, %v505_v12  ;;  %v601_v4 = vmul.f32 0.001, %v537_v9 }
 0x15b   :  { %v834_v55 = vadd.f32 64.0, %v1320_v3  ;;  %v866_v56 = vadd.f32 64.0, %v1352_v53  ;;  %v574_v27 = vmul.f32 0.001, %v510_v63  ;;  %v606_v17 = vmul.f32 0.001, %v542_v14 }
 0x15c   :  { %1119 = vst [vmem:[#allocation2 + $0x20] sm:$0xff] %v1081_v15  ;;  %1127 = vst [vmem:[#allocation2 + $0x60] sm:$0xff] %v1105_v31  ;;  %v508_v32 = vsub.f32 %v1788_v46, %v1915_v57  ;;  %v540_v33 = vsub.f32 %v1790_v47, %v1915_v57  ;;  %v640_v29 = vadd.f32 %v1926_v48, %v569_v16  ;;  %v1406_v38 = vcvt.f32.s32 %v1405_v39 }
 0x15d   :  { %v898_v8 = vmax.f32 %v834_v55, 0.0  ;;  %v930_v59 = vmax.f32 %v866_v56, 0.0  ;;  %v672_v45 = vadd.f32 %v1926_v48, %v601_v4  ;;  %v645_v18 = vadd.f32 %v1926_v48, %v574_v27 }
 0x15e   :  { %v677_v19 = vadd.f32 %v1926_v48, %v606_v17  ;;  %v572_v60 = vmul.f32 0.001, %v508_v32  ;;  %v604_v40 = vmul.f32 0.001, %v540_v33  ;;  %v704_v58 = vmul.f32 4.0, %v640_v29 }
 0x15f   :  { %v962_v22 = vmin.f32 %v898_v8, 255.0  ;;  %v994_v13 = vmin.f32 %v930_v59, 255.0  ;;  %v736_v61 = vmul.f32 4.0, %v672_v45  ;;  %v709_v46 = vmul.f32 4.0, %v645_v18 }
 0x160   :  { %v741_v26 = vmul.f32 4.0, %v677_v19  ;;  %v643_v47 = vadd.f32 %v1926_v48, %v572_v60  ;;  %v675_v44 = vadd.f32 %v1926_v48, %v604_v40  ;;  %v1318_v28 = vround.rtne.f32 %v704_v58 }
 0x161   :  { %v1407_v34 = vtrunc.f32 %v962_v22  ;;  %v1471_v10 = vtrunc.f32 %v994_v13  ;;  %v1350_v35 = vround.rtne.f32 %v736_v61  ;;  %v1470_v36 = vcvt.f32.s32 %v1469_v7 }
 0x162   :  { %v1323_v49 = vround.rtne.f32 %v709_v46  ;;  %v1355_v30 = vround.rtne.f32 %v741_v26  ;;  %v832_v52 = vadd.f32 64.0, %v1318_v28  ;;  %v707_v43 = vmul.f32 4.0, %v643_v47 }
 0x163   :  { %v1408_v62 = vcvt.f32.s32 %v1407_v34  ;;  %v1472_v24 = vcvt.f32.s32 %v1471_v10  ;;  %v864_v37 = vadd.f32 64.0, %v1350_v35  ;;  %v739_v6 = vmul.f32 4.0, %v675_v44 }
 0x164   :  { %v896_v3 = vmax.f32 %v832_v52, 0.0  ;;  %v1401_v12 = vtrunc.f32 %v1930_v25  ;;  %v1465_v9 = vtrunc.f32 %v1932_v42  ;;  %v837_v15 = vadd.f32 64.0, %v1323_v49 }
 0x165   :  { %v1083_v50 = vpack.c.b16 %v1408_v62, %v1406_v38  ;;  %v1107_v51 = vpack.c.b16 %v1472_v24, %v1470_v36  ;;  %v928_v53 = vmax.f32 %v864_v37, 0.0  ;;  %v869_v31 = vadd.f32 64.0, %v1355_v30 }
 0x166   :  { %v960_v39 = vmin.f32 %v896_v3, 255.0  ;;  %v511_v63 = vsub.f32 %v1792_v20, %v1915_v57  ;;  %v543_v14 = vsub.f32 %v1794_v21, %v1915_v57  ;;  %v1321_v55 = vround.rtne.f32 %v707_v43 }
 0x167   :  { %v992_v7 = vmin.f32 %v928_v53, 255.0  ;;  %v1353_v56 = vround.rtne.f32 %v739_v6  ;;  %v1402_v32 = vcvt.f32.s32 %v1401_v12  ;;  %v1466_v25 = vcvt.f32.s32 %v1465_v9 }
 0x168   :  { %v1403_v16 = vtrunc.f32 %v960_v39  ;;  %v575_v27 = vmul.f32 0.001, %v511_v63  ;;  %v607_v17 = vmul.f32 0.001, %v543_v14  ;;  %v901_v33 = vmax.f32 %v837_v15, 0.0 }
 0x169   :  { %v1467_v4 = vtrunc.f32 %v992_v7  ;;  %v933_v42 = vmax.f32 %v869_v31, 0.0  ;;  %v835_v20 = vadd.f32 64.0, %v1321_v55  ;;  %v867_v18 = vadd.f32 64.0, %v1353_v56 }
 0x16a   :  { %v1404_v8 = vcvt.f32.s32 %v1403_v16  ;;  %v646_v29 = vadd.f32 %v1926_v48, %v575_v27  ;;  %v678_v45 = vadd.f32 %v1926_v48, %v607_v17  ;;  %v965_v22 = vmin.f32 %v901_v33, 255.0 }
 0x16b   :  { %v1468_v59 = vcvt.f32.s32 %v1467_v4  ;;  %v997_v13 = vmin.f32 %v933_v42, 255.0  ;;  %v509_v58 = vsub.f32 %v1798_v0, %v1915_v57  ;;  %v541_v61 = vsub.f32 %v1800_v1, %v1915_v57 }
 0x16c   :  { %v1082_v19 = vpack.c.b16 %v1404_v8, %v1402_v32  ;;  %v710_v60 = vmul.f32 4.0, %v646_v29  ;;  %v742_v40 = vmul.f32 4.0, %v678_v45  ;;  %v514_v28 = vsub.f32 %v1808_v41, %v1915_v57 }
 0x16d   :  { %v1106_v21 = vpack.c.b16 %v1468_v59, %v1466_v25  ;;  %v573_v34 = vmul.f32 0.001, %v509_v58  ;;  %v605_v10 = vmul.f32 0.001, %v541_v61  ;;  %v546_v35 = vsub.f32 %v1810_v23, %v1915_v57 }
 0x16e   :  { %v1084_v46 = vpack.c.b8 %v1083_v50, %v1082_v19  ;;  %v1324_v47 = vround.rtne.f32 %v710_v60  ;;  %v1356_v44 = vround.rtne.f32 %v742_v40  ;;  %v512_v0 = vsub.f32 %v1812_v54, %v1915_v57 }
 0x16f   :  { %v1108_v26 = vpack.c.b8 %v1107_v51, %v1106_v21  ;;  %v544_v1 = vsub.f32 %v1814_v5, %v1915_v57  ;;  %v644_v49 = vadd.f32 %v1926_v48, %v573_v34  ;;  %v676_v30 = vadd.f32 %v1926_v48, %v605_v10 }
 0x170   :  { %1120 = vst [vmem:[#allocation2 + $0x28] sm:$0xff] %v1084_v46  ;;  %v838_v38 = vadd.f32 64.0, %v1324_v47  ;;  %v870_v36 = vadd.f32 64.0, %v1356_v44  ;;  %v578_v62 = vmul.f32 0.001, %v514_v28  ;;  %v899_v41 = vmax.f32 %v835_v20, 0.0 }
 0x171   :  { %1128 = vst [vmem:[#allocation2 + $0x68] sm:$0xff] %v1108_v26  ;;  %v610_v24 = vmul.f32 0.001, %v546_v35  ;;  %v931_v52 = vmax.f32 %v867_v18, 0.0  ;;  %v708_v43 = vmul.f32 4.0, %v644_v49  ;;  %v740_v6 = vmul.f32 4.0, %v676_v30 }
 0x172   :  { %v902_v37 = vmax.f32 %v838_v38, 0.0  ;;  %v934_v23 = vmax.f32 %v870_v36, 0.0  ;;  %v649_v50 = vadd.f32 %v1926_v48, %v578_v62  ;;  %v1413_v54 = vtrunc.f32 %v965_v22 }
 0x173   :  { %v681_v51 = vadd.f32 %v1926_v48, %v610_v24  ;;  %v1477_v3 = vtrunc.f32 %v997_v13  ;;  %v1322_v12 = vround.rtne.f32 %v708_v43  ;;  %v1354_v9 = vround.rtne.f32 %v740_v6  ;;  %v2009_v43 = vld [vmem:[#allocation5_spill] sm:$0xff] }
 0x174   :  { %v966_v53 = vmin.f32 %v902_v37, 255.0  ;;  %v998_v5 = vmin.f32 %v934_v23, 255.0  ;;  %v576_v15 = vmul.f32 0.001, %v512_v0  ;;  %v608_v31 = vmul.f32 0.001, %v544_v1 }
 0x175   :  { %v713_v63 = vmul.f32 4.0, %v649_v50  ;;  %v745_v14 = vmul.f32 4.0, %v681_v51  ;;  %v963_v55 = vmin.f32 %v899_v41, 255.0  ;;  %v995_v56 = vmin.f32 %v931_v52, 255.0  ;;  %v2010_v50 = vld [vmem:[#allocation6_spill] sm:$0xff] }
 0x176   :  { %v1415_v39 = vtrunc.f32 %v966_v53  ;;  %v1479_v7 = vtrunc.f32 %v998_v5  ;;  %v836_v16 = vadd.f32 64.0, %v1322_v12  ;;  %v868_v4 = vadd.f32 64.0, %v1354_v9 }
 0x177   :  { %v1414_v27 = vcvt.f32.s32 %v1413_v54  ;;  %v1478_v17 = vcvt.f32.s32 %v1477_v3  ;;  %v647_v8 = vadd.f32 %v1926_v48, %v576_v15  ;;  %v679_v59 = vadd.f32 %v1926_v48, %v608_v31 }
 0x178   :  { %v1416_v32 = vcvt.f32.s32 %v1415_v39  ;;  %v1480_v25 = vcvt.f32.s32 %v1479_v7  ;;  %v900_v33 = vmax.f32 %v836_v16, 0.0  ;;  %v932_v42 = vmax.f32 %v868_v4, 0.0 }
 0x179   :  { %v1327_v20 = vround.rtne.f32 %v713_v63  ;;  %v1359_v18 = vround.rtne.f32 %v745_v14  ;;  %v1409_v19 = vtrunc.f32 %v963_v55  ;;  %v1473_v21 = vtrunc.f32 %v995_v56 }
 0x17a   :  { %v1086_v29 = vpack.c.b16 %v1416_v32, %v1414_v27  ;;  %v1110_v45 = vpack.c.b16 %v1480_v25, %v1478_v17  ;;  %v964_v60 = vmin.f32 %v900_v33, 255.0  ;;  %v996_v40 = vmin.f32 %v932_v42, 255.0 }
 0x17b   :  { %v515_v22 = vsub.f32 %v1816_v11, %v1915_v57  ;;  %v547_v13 = vsub.f32 %v1818_v2, %v1915_v57  ;;  %v711_v46 = vmul.f32 4.0, %v647_v8  ;;  %v743_v26 = vmul.f32 4.0, %v679_v59 }
 0x17c   :  { %v1411_v58 = vtrunc.f32 %v964_v60  ;;  %v1475_v61 = vtrunc.f32 %v996_v40  ;;  %v841_v47 = vadd.f32 64.0, %v1327_v20  ;;  %v873_v44 = vadd.f32 64.0, %v1359_v18 }
 0x17d   :  { %v579_v34 = vmul.f32 0.001, %v515_v22  ;;  %v611_v10 = vmul.f32 0.001, %v547_v13  ;;  %v1410_v28 = vcvt.f32.s32 %v1409_v19  ;;  %v1474_v35 = vcvt.f32.s32 %v1473_v21 }
 0x17e   :  { %v1412_v38 = vcvt.f32.s32 %v1411_v58  ;;  %v1476_v36 = vcvt.f32.s32 %v1475_v61  ;;  %v1325_v30 = vround.rtne.f32 %v711_v46  ;;  %v1357_v2 = vround.rtne.f32 %v743_v26 }
 0x17f   :  { %v650_v0 = vadd.f32 %v1926_v48, %v579_v34  ;;  %v682_v1 = vadd.f32 %v1926_v48, %v611_v10  ;;  %v905_v62 = vmax.f32 %v841_v47, 0.0  ;;  %v937_v24 = vmax.f32 %v873_v44, 0.0 }
 0x180   :  { %v1085_v11 = vpack.c.b16 %v1412_v38, %v1410_v28  ;;  %v1109_v49 = vpack.c.b16 %v1476_v36, %v1474_v35  ;;  %v513_v6 = vsub.f32 %v2009_v43, %v1915_v57  ;;  %v545_v51 = vsub.f32 %v2010_v50, %v1915_v57 }
 0x181   :  { %v714_v41 = vmul.f32 4.0, %v650_v0  ;;  %v746_v52 = vmul.f32 4.0, %v682_v1  ;;  %v839_v53 = vadd.f32 64.0, %v1325_v30  ;;  %v871_v5 = vadd.f32 64.0, %v1357_v2 }
 0x182   :  { %v1087_v37 = vpack.c.b8 %v1086_v29, %v1085_v11  ;;  %v1111_v23 = vpack.c.b8 %v1110_v45, %v1109_v49  ;;  %v577_v12 = vmul.f32 0.001, %v513_v6  ;;  %v609_v9 = vmul.f32 0.001, %v545_v51 }
 0x183   :  { %v1328_v54 = vround.rtne.f32 %v714_v41  ;;  %v1360_v3 = vround.rtne.f32 %v746_v52  ;;  %v969_v15 = vmin.f32 %v905_v62, 255.0  ;;  %v1001_v31 = vmin.f32 %v937_v24, 255.0 }
 0x184   :  { %1121 = vst [vmem:[#allocation2 + $0x30] sm:$0xff] %v1087_v37  ;;  %1129 = vst [vmem:[#allocation2 + $0x70] sm:$0xff] %v1111_v23  ;;  %v648_v63 = vadd.f32 %v1926_v48, %v577_v12  ;;  %v680_v14 = vadd.f32 %v1926_v48, %v609_v9  ;;  %v903_v16 = vmax.f32 %v839_v53, 0.0  ;;  %v935_v57 = vmax.f32 %v871_v5, 0.0 }
 0x185   :  { %v842_v39 = vadd.f32 64.0, %v1328_v54  ;;  %v874_v7 = vadd.f32 64.0, %v1360_v3  ;;  %v1421_v17 = vtrunc.f32 %v969_v15  ;;  %v1485_v32 = vtrunc.f32 %v1001_v31 }
 0x186   :  { %v712_v4 = vmul.f32 4.0, %v648_v63  ;;  %v744_v27 = vmul.f32 4.0, %v680_v14  ;;  %v967_v45 = vmin.f32 %v903_v16, 255.0  ;;  %v999_v20 = vmin.f32 %v935_v57, 255.0 }
 0x187   :  { %v906_v55 = vmax.f32 %v842_v39, 0.0  ;;  %v938_v56 = vmax.f32 %v874_v7, 0.0  ;;  %v1422_v21 = vcvt.f32.s32 %v1421_v17  ;;  %v1486_v48 = vcvt.f32.s32 %v1485_v32 }
 0x188   :  { %v1326_v42 = vround.rtne.f32 %v712_v4  ;;  %v1358_v8 = vround.rtne.f32 %v744_v27  ;;  %v1417_v46 = vtrunc.f32 %v967_v45  ;;  %v1481_v26 = vtrunc.f32 %v999_v20 }
 0x189   :  { %v970_v25 = vmin.f32 %v906_v55, 255.0  ;;  %v1002_v33 = vmin.f32 %v938_v56, 255.0 }
 0x18a   :  { %v840_v18 = vadd.f32 64.0, %v1326_v42  ;;  %v872_v19 = vadd.f32 64.0, %v1358_v8  ;;  %v1418_v28 = vcvt.f32.s32 %v1417_v46  ;;  %v1482_v35 = vcvt.f32.s32 %v1481_v26 }
 0x18b   :  { %v1423_v59 = vtrunc.f32 %v970_v25  ;;  %v1487_v29 = vtrunc.f32 %v1002_v33 }
 0x18c   :  { %v904_v22 = vmax.f32 %v840_v18, 0.0  ;;  %v936_v13 = vmax.f32 %v872_v19, 0.0 }
 0x18d   :  { %v1424_v60 = vcvt.f32.s32 %v1423_v59  ;;  %v1488_v40 = vcvt.f32.s32 %v1487_v29 }
 0x18e   :  { %v968_v47 = vmin.f32 %v904_v22, 255.0  ;;  %v1000_v44 = vmin.f32 %v936_v13, 255.0 }
 0x18f   :  { %v1089_v58 = vpack.c.b16 %v1424_v60, %v1422_v21  ;;  %v1113_v61 = vpack.c.b16 %v1488_v40, %v1486_v48 }
 0x190   :  { %v1419_v34 = vtrunc.f32 %v968_v47  ;;  %v1483_v10 = vtrunc.f32 %v1000_v44 }
 0x192   :  { %v1420_v38 = vcvt.f32.s32 %v1419_v34  ;;  %v1484_v36 = vcvt.f32.s32 %v1483_v10 }
 0x194   :  { %v1088_v0 = vpack.c.b16 %v1420_v38, %v1418_v28  ;;  %v1112_v1 = vpack.c.b16 %v1484_v36, %v1482_v35 }
 0x196   :  { %v1090_v11 = vpack.c.b8 %v1089_v58, %v1088_v0  ;;  %v1114_v49 = vpack.c.b8 %v1113_v61, %v1112_v1 }
 0x198   :  { %1122 = vst [vmem:[#allocation2 + $0x38] sm:$0xff] %v1090_v11  ;;  %1130 = vst [vmem:[#allocation2 + $0x78] sm:$0xff] %v1114_v49 }
 0x199   :  { %1508 = shalt.err (!%p1505_p4)
}
 0x19a   :  { %s1509_s9 = scalar_lea.hbm %s2006_s4, 2048 }
 0x19b   :  { %p1510_p5 = scmp.ne.s32.totalorder %s2006_s4, %s1509_s9  ;;  %p1513_p6 = scmp.lt.u32.totalorder %s1509_s9, %s2006_s4 }
 0x19d   :  { %p1515_p7 = pnand %p1513_p6, %p1510_p5 }
 0x19f   :  { %1518 = shalt.err (!%p1515_p7)
}
 0x1a0   :  { %s1522_s14 = smov 128   ;;  %s1523_s15 = smov 8  }
 0x1a1   :  { %1142 = dma.vmem_to_hbm [thread:$0]  %s1137_s5, 2048, %s2006_s4, [#allocation3], %s1522_s14, %s1522_s14, %s1523_s15  }
 0x1a2   :  { %1519 = dma.done.wait [#allocation3], 2048  }
 0x1a3   :  { %1520 = vsyncadd [#allocation3], 4294965248 }
 0x1a4   :  { %1146 = vsyncpa [#allocation3], 1 }

</bundles_post_ra>
